<compile_context>
chip_gen: v7x
topology: tpu7x:2x2x1
jax: 0.10.0
libtpu: 0.0.40
codegen_flags: <defaults>
</compile_context>

<pallas_src>
import math

import jax
import jax.numpy as jnp
from jax.experimental import pallas as pl
from jax.experimental.pallas import tpu as pltpu


def _round_up(x, m):
    return ((x + m - 1) // m) * m


def _cdiv(a, b):
    return (a + b - 1) // b


# ----------------------------- kernels --------------------------------------


def _gcn_kernel_k1(x_ref, w_ref, b_ref, o_ref):
    """Whole K in one tile: single MXU pass, bias added in the epilogue."""
    o_ref[...] = b_ref[...] + jnp.dot(
        x_ref[...], w_ref[...], preferred_element_type=jnp.float32
    )


def _gcn_kernel_ktiled(x_ref, w_ref, b_ref, o_ref):
    """K (reduction) is grid axis 2.

    o_ref is f32 and its BlockSpec returns the same (i, j) block for every k,
    so it stays VMEM-resident across the K steps and doubles as the
    accumulator (no scratch, no finalize copy).  Bias is folded into the init.
    """
    k = pl.program_id(2)

    @pl.when(k == 0)
    def _init():
        o_ref[...] = jnp.broadcast_to(b_ref[...], o_ref.shape)

    o_ref[...] += jnp.dot(
        x_ref[...], w_ref[...], preferred_element_type=jnp.float32
    )


# ----------------------------- wrapper ---------------------------------------


def graph_forward(x, adj, weight, bias=None, *,
                  tm=512, tn=512, tk=None, use_bf16=True):
    """Pallas equivalent of Graph.forward(input, adj).

    x:      (N, in_features)
    adj:    (N, N)             -- unused by the returned value (as in torch)
    weight: (in_features, out_features)
    bias:   (out_features,) or None
    returns (N, out_features) float32
    """
    del adj  # torch.spmm(adj, support) is dead code w.r.t. the returned value

    n, fin = x.shape
    fin_w, fout = weight.shape
    assert fin_w == fin

    in_dtype = jnp.bfloat16 if use_bf16 else jnp.float32
    in_bytes = 2 if use_bf16 else 4
    sub = 16 if use_bf16 else 8          # sublane packing unit of the operand dtype
    if tk is None:
        tk = 4096 if use_bf16 else 2048  # collapse K entirely when it fits VMEM

    # ---- minimal alignment padding (sublane / 128-lane), grid that divides it.
    n_a = _round_up(n, sub)
    fin_a = _round_up(fin, 128)          # K MUST stay zero-padded (feeds the acc)
    fout_a = _round_up(fout, 128)        # lane-dense, unmasked output stores

    gm = _cdiv(n_a, tm)
    gn = _cdiv(fout_a, tn)
    gk = _cdiv(fin_a, tk)
    # v7x megacore occupancy: guarantee >=2 output blocks when possible.
    if gm == 1 and gn == 1 and n_a >= 2 * sub:
        gm = 2

    tm_e = _round_up(_cdiv(n_a, gm), sub)
    tn_e = _round_up(_cdiv(fout_a, gn), 128)
    tk_e = _round_up(_cdiv(fin_a, gk), 128)
    n_pad, fout_pad, fin_pad = tm_e * gm, tn_e * gn, tk_e * gk

    # ---- pad operands (zeros in padded K contribute nothing; padded M/N rows
    #      and cols are sliced off after the call).
    x_p = x.astype(in_dtype)
    if (n_pad, fin_pad) != (n, fin):
        x_p = jnp.pad(x_p, ((0, n_pad - n), (0, fin_pad - fin)))
    w_p = weight.astype(in_dtype)
    if (fin_pad, fout_pad) != (fin, fout):
        w_p = jnp.pad(w_p, ((0, fin_pad - fin), (0, fout_pad - fout)))
    if bias is not None:
        b_p = jnp.pad(bias.astype(jnp.float32), (0, fout_pad - fout))
    else:
        b_p = jnp.zeros((fout_pad,), jnp.float32)
    b_p = b_p.reshape(1, fout_pad)

    # ---- VMEM budget: double-buffered inputs + resident f32 output tile.
    est = (2 * (tm_e * tk_e + tk_e * tn_e) * in_bytes
           + 2 * (tm_e * tn_e + tn_e) * 4)
    vmem_limit = max(32 * 1024 * 1024, min(48 * 1024 * 1024, 2 * est))

    if gk == 1:
        grid = (gm, gn)
        kernel = _gcn_kernel_k1
        in_specs = [
            pl.BlockSpec((tm_e, tk_e), lambda i, j: (i, 0)),   # x
            pl.BlockSpec((tk_e, tn_e), lambda i, j: (0, j)),   # weight
            pl.BlockSpec((1, tn_e), lambda i, j: (0, j)),      # bias
        ]
        out_specs = pl.BlockSpec((tm_e, tn_e), lambda i, j: (i, j))
        dims = ("parallel", "parallel")
    else:
        grid = (gm, gn, gk)
        kernel = _gcn_kernel_ktiled
        in_specs = [
            pl.BlockSpec((tm_e, tk_e), lambda i, j, k: (i, k)),   # x
            pl.BlockSpec((tk_e, tn_e), lambda i, j, k: (k, j)),   # weight
            pl.BlockSpec((1, tn_e), lambda i, j, k: (0, j)),      # bias
        ]
        out_specs = pl.BlockSpec((tm_e, tn_e), lambda i, j, k: (i, j))
        dims = ("parallel", "parallel", "arbitrary")

    out_p = pl.pallas_call(
        kernel,
        out_shape=jax.ShapeDtypeStruct((n_pad, fout_pad), jnp.float32),
        grid_spec=pltpu.PrefetchScalarGridSpec(
            num_scalar_prefetch=0,
            grid=grid,
            in_specs=in_specs,
            out_specs=out_specs,
        ),
        compiler_params=pltpu.CompilerParams(
            dimension_semantics=dims,
            vmem_limit_bytes=vmem_limit,
            allow_input_fusion=[True, True, True],
        ),
    )(x_p, w_p, b_p)

    if (n_pad, fout_pad) != (n, fout):
        out_p = out_p[:n, :fout]
    return out_p


def init_graph_params(key, in_features, out_features, bias=True):
    """Deterministic re-implementation of Graph.reset_parameters()."""
    stdv = 1.0 / math.sqrt(out_features)
    kw, kb = jax.random.split(key)
    weight = jax.random.uniform(
        kw, (in_features, out_features), jnp.float32, minval=-stdv, maxval=stdv
    )
    b = None
    if bias:
        b = jax.random.uniform(
            kb, (out_features,), jnp.float32, minval=-stdv, maxval=stdv
        )
    return weight, b


if __name__ == "__main__":
    key = jax.random.PRNGKey(0)
    k_x, k_adj, k_p, k_x2, k_p2 = jax.random.split(key, 5)

    # --- small shapes (single-tile path), f32 operands: tight check ----------
    n_nodes, in_features, out_features = 8, 32, 32
    x = jax.random.normal(k_x, (n_nodes, in_features), jnp.float32)
    adj = jax.random.uniform(k_adj, (n_nodes, n_nodes), jnp.float32)
    weight, bias = init_graph_params(k_p, in_features, out_features, bias=True)

    out = jax.block_until_ready(
        graph_forward(x, adj, weight, bias, use_bf16=False))
    ref = x @ weight + bias[None, :]
    assert out.shape == (n_nodes, out_features)
    assert jnp.allclose(out, ref, atol=1e-5, rtol=1e-5)

    out_nb = jax.block_until_ready(
        graph_forward(x, adj, weight, None, use_bf16=False))
    assert jnp.allclose(out_nb, x @ weight, atol=1e-5, rtol=1e-5)

    # --- non-aligned shapes: minimal padding, 2-block M split, collapsed K ---
    n2, fin2, fout2 = 300, 700, 200
    x2 = jax.random.normal(k_x2, (n2, fin2), jnp.float32)
    adj2 = jnp.zeros((n2, n2), jnp.float32)
    w2, b2 = init_graph_params(k_p2, fin2, fout2, bias=True)
    ref2 = x2 @ w2 + b2[None, :]

    # f32 operand path (tight)
    out2_f32 = jax.block_until_ready(
        graph_forward(x2, adj2, w2, b2, use_bf16=False))
    assert out2_f32.shape == (n2, fout2)
    assert jnp.allclose(out2_f32, ref2, atol=1e-4, rtol=1e-4)

    # K-tiled accumulator path (small tk forces gk > 1)
    out2_kt = jax.block_until_ready(
        graph_forward(x2, adj2, w2, b2, use_bf16=False, tk=256))
    assert jnp.allclose(out2_kt, ref2, atol=1e-4, rtol=1e-4)

    # default bf16-operand / f32-accumulate path (the fast one)
    out2_bf = jax.block_until_ready(graph_forward(x2, adj2, w2, b2))
    ref2_bf = (jnp.dot(x2.astype(jnp.bfloat16).astype(jnp.float32),
                       w2.astype(jnp.bfloat16).astype(jnp.float32),
                       precision=jax.lax.Precision.HIGHEST)
               + b2[None, :])
    assert out2_bf.shape == (n2, fout2)
    assert jnp.allclose(out2_bf, ref2_bf, atol=5e-3, rtol=5e-3)
    assert jnp.allclose(out2_bf, ref2, atol=1e-1, rtol=1e-1)

    print("KERNEL_OK")
</pallas_src>

<mosaic_0001>
module attributes {stable_mosaic.version = 11 : i64} {
  func.func @_gcn_kernel_k1(%arg0: i32, %arg1: i32, %arg2: memref<8x128xf32, #tpu.memory_space<vmem>>, %arg3: memref<128x128xf32, #tpu.memory_space<vmem>>, %arg4: memref<1x128xf32, #tpu.memory_space<vmem>>, %arg5: memref<8x128xf32, #tpu.memory_space<vmem>>) attributes {dimension_semantics = [#tpu.dimension_semantics<parallel>, #tpu.dimension_semantics<parallel>], iteration_bounds = array<i64: 1, 1>, scalar_prefetch = 0 : i64, scratch_operands = 0 : i64, tpu.core_type = #tpu.core_type<tc>, window_params = [{transform_indices = @transform_0, window_bounds = array<i64: 8, 128>}, {transform_indices = @transform_1, window_bounds = array<i64: 128, 128>}, {transform_indices = @transform_2, window_bounds = array<i64: 1, 128>}, {transform_indices = @transform_3, window_bounds = array<i64: 8, 128>}]} {
    %c0 = arith.constant 0 : index
    %c0_0 = arith.constant 0 : index
    %0 = vector.load %arg4[%c0, %c0_0] : memref<1x128xf32, #tpu.memory_space<vmem>>, vector<1x128xf32>
    %c0_1 = arith.constant 0 : index
    %c0_2 = arith.constant 0 : index
    %1 = vector.load %arg2[%c0_1, %c0_2] : memref<8x128xf32, #tpu.memory_space<vmem>>, vector<8x128xf32>
    %c0_3 = arith.constant 0 : index
    %c0_4 = arith.constant 0 : index
    %2 = vector.load %arg3[%c0_3, %c0_4] : memref<128x128xf32, #tpu.memory_space<vmem>>, vector<128x128xf32>
    %cst = arith.constant dense<0.000000e+00> : vector<8x128xf32>
    %3 = tpu.matmul %1, %2, %cst {dimension_numbers = #tpu.dot_dimension_numbers<[1], [0], [0], [1], [0, 0, 1, 1], [], []>} : vector<8x128xf32>, vector<128x128xf32>, vector<8x128xf32> -> vector<8x128xf32>
    %4 = vector.broadcast %0 : vector<1x128xf32> to vector<8x128xf32>
    %5 = arith.addf %4, %3 : vector<8x128xf32>
    %c0_5 = arith.constant 0 : index
    %c0_6 = arith.constant 0 : index
    %6 = vector.load %arg5[%c0_5, %c0_6] : memref<8x128xf32, #tpu.memory_space<vmem>>, vector<8x128xf32>
    tpu.vector_store %arg5[%c0_5, %c0_6], %5 {strides = array<i32>} : memref<8x128xf32, #tpu.memory_space<vmem>>, vector<8x128xf32>,
    return
  }
  func.func @transform_0(%arg0: i32, %arg1: i32) -> (i32, i32) {
    %c0_i32 = arith.constant 0 : i32
    %c0_i32_0 = arith.constant 0 : i32
    return %arg0, %c0_i32 : i32, i32
  }
  func.func @transform_1(%arg0: i32, %arg1: i32) -> (i32, i32) {
    %c0_i32 = arith.constant 0 : i32
    %c0_i32_0 = arith.constant 0 : i32
    return %c0_i32, %arg1 : i32, i32
  }
  func.func @transform_2(%arg0: i32, %arg1: i32) -> (i32, i32) {
    %c0_i32 = arith.constant 0 : i32
    %c0_i32_0 = arith.constant 0 : i32
    return %c0_i32, %arg1 : i32, i32
  }
  func.func @transform_3(%arg0: i32, %arg1: i32) -> (i32, i32) {
    %c0_i32 = arith.constant 0 : i32
    return %arg0, %arg1 : i32, i32
  }
}

</mosaic_0001>

<bundles_post_ra>
// kernel: tpu_custom_call.1
= control target key start
LH: loop header
LB: loop body
LE: loop exit
PB: predicated region body
PF: predicated region fallthrough
CT: control target
= control target key end

     0   :  { %8 = vsyncpa [#allocation3], 0  ;;  %s384_s0 = inlined_call_operand.hbm [shape: f32[8,128], index: 0, kind: input, shape index: {}]   ;;  %s385_s1 = inlined_call_operand.hbm [shape: f32[128,128], index: 1, kind: input, shape index: {}]   ;;  %s386_s2 = inlined_call_operand.vmem [shape: f32[1,128], index: 2, kind: input, shape index: {}]   ;;  %s387_s3 = inlined_call_operand.hbm [shape: f32[8,128], index: 3, kind: output, shape index: {}]  }
   0x1   :  { %9 = vsyncpa [#allocation6], 0 }
   0x2   :  { %10 = vsyncpa [#allocation4], 0  ;;  %s310_s12 = smov [#allocation2]   ;;  %s311_s14 = smov [#allocation5]  }
   0x3   :  { %s17_s13 = sshll.u32 %s310_s12, 4  ;;  %s26_s15 = sshll.u32 %s311_s14, 4  ;;  %s18_s13 = int_to_ptr.vmem [resolvable:$true] %s17_s13  ;;  %s338_s15 = int_to_ptr.vmem [resolvable:$true] %s26_s15 }
   0x4   :  { %s238_s18 = scalar_lea.hbm %s384_s0, 128 }
   0x5   :  { %p239_p0 = scmp.ne.s32.totalorder %s384_s0, %s238_s18  ;;  %p242_p1 = scmp.lt.u32.totalorder %s238_s18, %s384_s0 }
   0x7   :  { %p244_p2 = pnand %p242_p1, %p239_p0 }
   0x9   :  { %247 = shalt.err (!%p244_p2)
}
   0xa   :  { %s248_s23 = scalar_lea.vmem %s18_s13, 128  ;;  %p253_p4 = scmp.lt.s32.totalorder %s18_s13, %s18_s13 }
   0xb   :  { %p249_p3 = scmp.ne.s32.totalorder %s18_s13, %s248_s23  ;;  %p254_p5 = scmp.lt.s32.totalorder %s248_s23, %s248_s23 }
   0xd   :  { %p255_p6 = por %p254_p5, %p253_p4 }
   0xf   :  { %p256_p7 = pnand %p255_p6, %p249_p3 }
  0x11   :  { %259 = shalt.err (!%p256_p7)
}
  0x12   :  { %20 = dma.hbm_to_vmem [thread:$0]  %s384_s0, 128, %s18_s13, [#allocation3]  }
  0x13   :  { %s260_s28 = scalar_lea.hbm %s385_s1, 2048 }
  0x14   :  { %p261_p8 = scmp.ne.s32.totalorder %s385_s1, %s260_s28  ;;  %p264_p9 = scmp.lt.u32.totalorder %s260_s28, %s385_s1 }
  0x16   :  { %p266_p10 = pnand %p264_p9, %p261_p8 }
  0x18   :  { %269 = shalt.err (!%p266_p10)
}
  0x19   :  { %s270_s6 = scalar_lea.vmem %s338_s15, 2048  ;;  %p275_p12 = scmp.lt.s32.totalorder %s338_s15, %s338_s15 }
  0x1a   :  { %p271_p11 = scmp.ne.s32.totalorder %s338_s15, %s270_s6  ;;  %p276_p13 = scmp.lt.s32.totalorder %s270_s6, %s270_s6 }
  0x1c   :  { %p277_p0 = por %p276_p13, %p275_p12 }
  0x1e   :  { %p278_p1 = pnand %p277_p0, %p271_p11 }
  0x20   :  { %281 = shalt.err (!%p278_p1)
}
  0x21   :  { %s312_s0 = smov 128   ;;  %s313_s7 = smov 8  }
  0x22   :  { %32 = dma.hbm_to_vmem [thread:$0]  %s385_s1, 2048, %s338_s15, [#allocation6], %s312_s0, %s312_s0, %s313_s7  }
  0x23   :  { %304 = dma.done.wait [#allocation3], 128  }
  0x24   :  { %305 = vsyncadd [#allocation3], 4294967168 }
  0x25   :  { %306 = dma.done.wait [#allocation6], 2048  }
  0x26   :  { %307 = vsyncadd [#allocation6], 4294965248  ;;  %v314_v0 = vmov 0.0|0.0   ;;  %vm315_vm0 = vmmov 0   ;;  %v316_v1 = vmov 0.0   ;;  %v43_v2 = vld [vmem:[#allocation5] sm:$0xff] }
  0x27   :  { %206 = vmatprep.subr.bf16.mxu0 %v314_v0  ;;  %203 = vmatprep.mubr.msk.f32.mxu0 %vm315_vm0, %v316_v1  ;;  %v44_v3 = vld [vmem:[#allocation5 + $0x8] sm:$0xff]  ;;  %v45_v4 = vld [vmem:[#allocation5 + $0x10] sm:$0xff]  ;;  %v46_v6 = vld [vmem:[#allocation5 + $0x18] sm:$0xff]  ;;  %s317_s11 = smov [#allocation7]  }
  0x28   :  { %v207_v5 = vpack.c.bf16 %v44_v3, %v43_v2  ;;  %v210_v7 = vpack.c.bf16 %v46_v6, %v45_v4  ;;  %v47_v8 = vld [vmem:[#allocation5 + $0x20] sm:$0xff]  ;;  %v48_v9 = vld [vmem:[#allocation5 + $0x28] sm:$0xff]  ;;  %v49_v11 = vld [vmem:[#allocation5 + $0x30] sm:$0xff]  ;;  %s143_s12 = sshll.u32 %s317_s11, 4  ;;  %s144_s12 = int_to_ptr.vmem [resolvable:$true] %s143_s12 }
  0x29   :  { %v213_v10 = vpack.c.bf16 %v48_v9, %v47_v8  ;;  %v50_v12 = vld [vmem:[#allocation5 + $0x38] sm:$0xff]  ;;  %v51_v14 = vld [vmem:[#allocation5 + $0x40] sm:$0xff]  ;;  %v52_v15 = vld [vmem:[#allocation5 + $0x48] sm:$0xff]  ;;  %s282_s13 = scalar_lea.vmem %s144_s12, 128  ;;  %p287_p3 = scmp.lt.s32.totalorder %s144_s12, %s144_s12 }
  0x2a   :  { %208 = vmatpush3.bf16.msra.mxu0 %v207_v5  ;;  %v216_v13 = vpack.c.bf16 %v50_v12, %v49_v11  ;;  %v219_v16 = vpack.c.bf16 %v52_v15, %v51_v14  ;;  %v53_v17 = vld [vmem:[#allocation5 + $0x50] sm:$0xff]  ;;  %v54_v18 = vld [vmem:[#allocation5 + $0x58] sm:$0xff]  ;;  %v55_v20 = vld [vmem:[#allocation5 + $0x60] sm:$0xff]  ;;  %p283_p2 = scmp.ne.s32.totalorder %s144_s12, %s282_s13  ;;  %p288_p4 = scmp.lt.s32.totalorder %s282_s13, %s282_s13 }
  0x2b   :  { %209 = vmatprep.subr.bf16.mxu0 %v314_v0  ;;  %v222_v19 = vpack.c.bf16 %v54_v18, %v53_v17  ;;  %v56_v21 = vld [vmem:[#allocation5 + $0x68] sm:$0xff]  ;;  %v57_v23 = vld [vmem:[#allocation5 + $0x70] sm:$0xff]  ;;  %v58_v24 = vld [vmem:[#allocation5 + $0x78] sm:$0xff] }
  0x2c   :  { %v225_v22 = vpack.c.bf16 %v56_v21, %v55_v20  ;;  %v228_v25 = vpack.c.bf16 %v58_v24, %v57_v23  ;;  %v42_v26 = vld [vmem:[#allocation2] sm:$0xff]  ;;  %p289_p5 = por %p288_p4, %p287_p3 }
  0x2d   :  { %v153_v27 = vld [vmem:[%s386_s2] ss:$0 sm:$0xff] }
  0x2e   :  { %211 = vmatpush3.bf16.msra.mxu0 %v210_v7  ;;  %p290_p6 = pnand %p289_p5, %p283_p2 }
  0x2f   :  { %212 = vmatprep.subr.bf16.mxu0 %v314_v0 }
  0x32   :  { %214 = vmatpush3.bf16.msra.mxu0 %v213_v10 }
  0x33   :  { %215 = vmatprep.subr.bf16.mxu0 %v314_v0 }
  0x36   :  { %217 = vmatpush3.bf16.msra.mxu0 %v216_v13 }
  0x37   :  { %218 = vmatprep.subr.bf16.mxu0 %v314_v0 }
  0x3a   :  { %220 = vmatpush3.bf16.msra.mxu0 %v219_v16 }
  0x3b   :  { %221 = vmatprep.subr.bf16.mxu0 %v314_v0 }
  0x3e   :  { %223 = vmatpush3.bf16.msra.mxu0 %v222_v19 }
  0x3f   :  { %224 = vmatprep.subr.bf16.mxu0 %v314_v0 }
  0x42   :  { %226 = vmatpush3.bf16.msra.mxu0 %v225_v22 }
  0x43   :  { %227 = vmatprep.subr.bf16.mxu0 %v314_v0 }
  0x46   :  { %229 = vmatpush3.bf16.msra.mxu0 %v228_v25 }
  0x49   :  { %204 = vmatmul.mubr.f32.vlgmr.msra.gmra.mrb[0].mxu0 %v42_v26 }
 0x11c   :  { %v125_v28 = vpop.f32.mrb[0].mxu0 }
 0x11d   :  { %v135_v29 = vadd.f32 %v153_v27, %v125_v28  ;;  %v205_v30 = vpop.f32.mrb[1].mxu0 }
 0x11f   :  { %136 = vst [vmem:[#allocation7] sm:$0xff] %v135_v29 }
 0x120   :  { %293 = shalt.err (!%p290_p6)
}
 0x121   :  { %s294_s16 = scalar_lea.hbm %s387_s3, 128 }
 0x122   :  { %p295_p7 = scmp.ne.s32.totalorder %s387_s3, %s294_s16  ;;  %p298_p8 = scmp.lt.u32.totalorder %s294_s16, %s387_s3 }
 0x124   :  { %p300_p9 = pnand %p298_p8, %p295_p7 }
 0x126   :  { %303 = shalt.err (!%p300_p9)
}
 0x127   :  { %146 = dma.vmem_to_hbm [thread:$0]  %s144_s12, 128, %s387_s3, [#allocation4]  }
 0x128   :  { %308 = dma.done.wait [#allocation4], 128  }
 0x129   :  { %309 = vsyncadd [#allocation4], 4294967168 }
 0x12a   :  { %150 = vsyncpa [#allocation3], 1 }
 0x12b   :  { %151 = vsyncpa [#allocation6], 1 }
 0x12c   :  { %152 = vsyncpa [#allocation4], 1 }

</bundles_post_ra>
